<compile_context>
chip_gen: v6e
topology: v6e:2x2x1
jax: 0.10.0
libtpu: 0.0.40
codegen_flags: <defaults>
</compile_context>

<pallas_src>
import math

import jax
import jax.numpy as jnp
from jax.experimental import pallas as pl
from jax.experimental.pallas import tpu as pltpu


def _round_up(x, m):
    return ((x + m - 1) // m) * m


def mlp_kernel(x_ref, w1_ref, b1_ref, w2_ref, b2_ref, o_ref):
    # First linear: bf16 x bf16 -> f32 accumulate on the MXU.
    h = jnp.dot(x_ref[...], w1_ref[...], preferred_element_type=jnp.float32)
    # Bias + tanh in f32 (tanh goes to the EUP; VPU does the add).
    h = jnp.tanh(h + b1_ref[...])
    # Second linear: feed the MXU in bf16 again, accumulate f32.
    out = jnp.dot(h.astype(w2_ref.dtype), w2_ref[...],
                  preferred_element_type=jnp.float32)
    o_ref[...] = (out + b2_ref[...]).astype(o_ref.dtype)


def _choose_tile_b(b8, f, e, c_pad, compute_bytes,
                   vmem_budget=24 * 1024 * 1024):
    """Pick the batch tile: multiple of 8, <= 512 rows, >= 2 grid steps when
    the batch allows it, and a per-step working set that fits the VMEM budget
    (double-buffered x/out tiles + resident weights + f32 hidden tile)."""
    tile_b = min(512, b8)
    if b8 >= 16:
        # Guarantee at least two grid steps so the "parallel" batch axis can be
        # split across v7x's two TensorCores and the pipeline actually overlaps.
        tile_b = min(tile_b, max(8, (b8 // 2) // 8 * 8))
    tile_b = max(8, _round_up(tile_b, 8))

    # Weights/biases are resident once (double-buffering of grid-constant
    # blocks is cheap since the block index never changes, but budget 2x to be
    # safe), plus double-buffered x/out tiles and the f32 hidden activation.
    w_bytes = 2 * (f * e + e * c_pad) * compute_bytes + 2 * (e + c_pad) * 4
    while tile_b > 8:
        io_bytes = 2 * tile_b * f * compute_bytes + 2 * tile_b * c_pad * 4
        h_bytes = tile_b * e * 4
        if w_bytes + io_bytes + h_bytes <= vmem_budget:
            break
        tile_b //= 2
        tile_b = max(8, (tile_b // 8) * 8)
    return max(8, tile_b)


def mlp_forward(x, w1, b1, w2, b2, *, tile_b=None,
                compute_dtype=jnp.bfloat16):
    """x: (B, F); w1: (F, E); b1: (E,)/(1,E); w2: (E, C); b2: (C,)/(1,C)."""
    B, F = x.shape
    E = w1.shape[1]
    C = w2.shape[1]

    b1 = jnp.asarray(b1, jnp.float32).reshape(1, E)
    b2 = jnp.asarray(b2, jnp.float32).reshape(1, C)

    # Lane-dense output: pad classes to a multiple of 128 (zero columns),
    # slice the pad off after the call.
    Cp = _round_up(C, 128)
    if Cp != C:
        w2 = jnp.pad(w2, ((0, 0), (0, Cp - C)))
        b2 = jnp.pad(b2, ((0, 0), (0, Cp - C)))

    compute_bytes = jnp.dtype(compute_dtype).itemsize
    B8 = _round_up(B, 8)
    if tile_b is None:
        tile_b = _choose_tile_b(B8, F, E, Cp, compute_bytes)
    tile_b = max(8, _round_up(int(tile_b), 8))

    # Pad the batch up to a tile multiple (extra rows are zeros, dropped later).
    Bp = _round_up(B, tile_b)
    x_pad = jnp.pad(x, ((0, Bp - B), (0, 0))) if Bp != B else x

    # bf16 MXU inputs; biases stay f32.
    x_c = x_pad.astype(compute_dtype)
    w1_c = w1.astype(compute_dtype)
    w2_c = w2.astype(compute_dtype)

    grid = (Bp // tile_b,)
    out_padded = pl.pallas_call(
        mlp_kernel,
        out_shape=jax.ShapeDtypeStruct((Bp, Cp), jnp.float32),
        grid_spec=pl.GridSpec(
            grid=grid,
            in_specs=[
                pl.BlockSpec((tile_b, F), lambda i: (i, 0)),   # x tile
                pl.BlockSpec((F, E), lambda i: (0, 0)),        # W1 (grid-constant)
                pl.BlockSpec((1, E), lambda i: (0, 0)),        # b1
                pl.BlockSpec((E, Cp), lambda i: (0, 0)),       # W2 (grid-constant)
                pl.BlockSpec((1, Cp), lambda i: (0, 0)),       # b2
            ],
            out_specs=pl.BlockSpec((tile_b, Cp), lambda i: (i, 0)),
        ),
        compiler_params=pltpu.CompilerParams(
            dimension_semantics=("parallel",),
            vmem_limit_bytes=40 * 1024 * 1024,
        ),
    )(x_c, w1_c, b1, w2_c, b2)

    return out_padded[:B, :C]


def init_linear_params(key, fan_in, fan_out, dtype=jnp.float32):
    # Mimic torch.nn.Linear default init: U(-1/sqrt(fan_in), 1/sqrt(fan_in)).
    kw, kb = jax.random.split(key)
    bound = 1.0 / math.sqrt(fan_in)
    # Stored as (fan_in, fan_out) so the kernel can use x @ W directly.
    w = jax.random.uniform(kw, (fan_in, fan_out), dtype, -bound, bound)
    b = jax.random.uniform(kb, (1, fan_out), dtype, -bound, bound)
    return w, b


if __name__ == "__main__":
    # Small shapes consistent with Model(input_features, embedding_size, num_classes).
    batch = 8
    input_features = 32
    embedding_size = 64
    num_classes = 16

    key = jax.random.PRNGKey(0)
    kx, k1, k2 = jax.random.split(key, 3)

    x = jax.random.normal(kx, (batch, input_features), jnp.float32)
    w1, b1 = init_linear_params(k1, input_features, embedding_size)
    w2, b2 = init_linear_params(k2, embedding_size, num_classes)

    out = mlp_forward(x, w1, b1, w2, b2)
    out = jax.block_until_ready(out)

    # Reference in plain JAX (same math as the PyTorch module), f32.
    ref = jnp.tanh(x @ w1 + b1) @ w2 + b2
    assert out.shape == (batch, num_classes)
    # bf16 MXU inputs with f32 accumulation -> loosened tolerance vs. f32 ref.
    assert jnp.allclose(out, ref, atol=5e-2, rtol=5e-2), (
        float(jnp.max(jnp.abs(out - ref))))

    print("KERNEL_OK")
</pallas_src>

<mosaic_0001>
module attributes {stable_mosaic.version = 11 : i64} {
  func.func @mlp_kernel(%arg0: i32, %arg1: memref<8x32xbf16, #tpu.memory_space<vmem>>, %arg2: memref<32x64xbf16, #tpu.memory_space<vmem>>, %arg3: memref<1x64xf32, #tpu.memory_space<vmem>>, %arg4: memref<64x128xbf16, #tpu.memory_space<vmem>>, %arg5: memref<1x128xf32, #tpu.memory_space<vmem>>, %arg6: memref<8x128xf32, #tpu.memory_space<vmem>>) attributes {dimension_semantics = [#tpu.dimension_semantics<parallel>], iteration_bounds = array<i64: 1>, scalar_prefetch = 0 : i64, scratch_operands = 0 : i64, tpu.core_type = #tpu.core_type<tc>, window_params = [{transform_indices = @transform_0, window_bounds = array<i64: 8, 32>}, {pipeline_mode = #tpu.pipeline_mode<synchronous>, transform_indices = @transform_1, window_bounds = array<i64: 32, 64>}, {pipeline_mode = #tpu.pipeline_mode<synchronous>, transform_indices = @transform_2, window_bounds = array<i64: 1, 64>}, {pipeline_mode = #tpu.pipeline_mode<synchronous>, transform_indices = @transform_3, window_bounds = array<i64: 64, 128>}, {pipeline_mode = #tpu.pipeline_mode<synchronous>, transform_indices = @transform_4, window_bounds = array<i64: 1, 128>}, {transform_indices = @transform_5, window_bounds = array<i64: 8, 128>}]} {
    %c0 = arith.constant 0 : index
    %c0_0 = arith.constant 0 : index
    %0 = vector.load %arg1[%c0, %c0_0] : memref<8x32xbf16, #tpu.memory_space<vmem>>, vector<8x32xbf16>
    %c0_1 = arith.constant 0 : index
    %c0_2 = arith.constant 0 : index
    %1 = vector.load %arg2[%c0_1, %c0_2] : memref<32x64xbf16, #tpu.memory_space<vmem>>, vector<32x64xbf16>
    %cst = arith.constant dense<0.000000e+00> : vector<8x64xf32>
    %2 = tpu.matmul %0, %1, %cst {dimension_numbers = #tpu.dot_dimension_numbers<[1], [0], [0], [1], [0, 0, 1, 1], [], []>} : vector<8x32xbf16>, vector<32x64xbf16>, vector<8x64xf32> -> vector<8x64xf32>
    %c0_3 = arith.constant 0 : index
    %c0_4 = arith.constant 0 : index
    %3 = vector.load %arg3[%c0_3, %c0_4] : memref<1x64xf32, #tpu.memory_space<vmem>>, vector<1x64xf32>
    %4 = vector.broadcast %3 : vector<1x64xf32> to vector<8x64xf32>
    %5 = arith.addf %2, %4 : vector<8x64xf32>
    %6 = math.tanh %5 : vector<8x64xf32>
    %7 = arith.truncf %6 : vector<8x64xf32> to vector<8x64xbf16>
    %c0_5 = arith.constant 0 : index
    %c0_6 = arith.constant 0 : index
    %8 = vector.load %arg4[%c0_5, %c0_6] : memref<64x128xbf16, #tpu.memory_space<vmem>>, vector<64x128xbf16>
    %cst_7 = arith.constant dense<0.000000e+00> : vector<8x128xf32>
    %9 = tpu.matmul %7, %8, %cst_7 {dimension_numbers = #tpu.dot_dimension_numbers<[1], [0], [0], [1], [0, 0, 1, 1], [], []>} : vector<8x64xbf16>, vector<64x128xbf16>, vector<8x128xf32> -> vector<8x128xf32>
    %c0_8 = arith.constant 0 : index
    %c0_9 = arith.constant 0 : index
    %10 = vector.load %arg5[%c0_8, %c0_9] : memref<1x128xf32, #tpu.memory_space<vmem>>, vector<1x128xf32>
    %11 = vector.broadcast %10 : vector<1x128xf32> to vector<8x128xf32>
    %12 = arith.addf %9, %11 : vector<8x128xf32>
    %c0_10 = arith.constant 0 : index
    %c0_11 = arith.constant 0 : index
    %13 = vector.load %arg6[%c0_10, %c0_11] : memref<8x128xf32, #tpu.memory_space<vmem>>, vector<8x128xf32>
    tpu.vector_store %arg6[%c0_10, %c0_11], %12 {strides = array<i32>} : memref<8x128xf32, #tpu.memory_space<vmem>>, vector<8x128xf32>,
    return
  }
  func.func @transform_0(%arg0: i32) -> (i32, i32) {
    %c0_i32 = arith.constant 0 : i32
    %c0_i32_0 = arith.constant 0 : i32
    return %arg0, %c0_i32 : i32, i32
  }
  func.func @transform_1(%arg0: i32) -> (i32, i32) {
    %c0_i32 = arith.constant 0 : i32
    %c0_i32_0 = arith.constant 0 : i32
    %c0_i32_1 = arith.constant 0 : i32
    return %c0_i32, %c0_i32_0 : i32, i32
  }
  func.func @transform_2(%arg0: i32) -> (i32, i32) {
    %c0_i32 = arith.constant 0 : i32
    %c0_i32_0 = arith.constant 0 : i32
    %c0_i32_1 = arith.constant 0 : i32
    return %c0_i32, %c0_i32_0 : i32, i32
  }
  func.func @transform_3(%arg0: i32) -> (i32, i32) {
    %c0_i32 = arith.constant 0 : i32
    %c0_i32_0 = arith.constant 0 : i32
    %c0_i32_1 = arith.constant 0 : i32
    return %c0_i32, %c0_i32_0 : i32, i32
  }
  func.func @transform_4(%arg0: i32) -> (i32, i32) {
    %c0_i32 = arith.constant 0 : i32
    %c0_i32_0 = arith.constant 0 : i32
    %c0_i32_1 = arith.constant 0 : i32
    return %c0_i32, %c0_i32_0 : i32, i32
  }
  func.func @transform_5(%arg0: i32) -> (i32, i32) {
    %c0_i32 = arith.constant 0 : i32
    %c0_i32_0 = arith.constant 0 : i32
    return %arg0, %c0_i32 : i32, i32
  }
}

</mosaic_0001>

<bundles_post_ra>
// kernel: tpu_custom_call.1
= control target key start
LH: loop header
LB: loop body
LE: loop exit
PB: predicated region body
PF: predicated region fallthrough
CT: control target
= control target key end

     0   :  { %10 = vsyncpa [#allocation3], 0  ;;  %s427_s0 = inlined_call_operand.hbm [shape: bf16[8,32], index: 0, kind: input, shape index: {}]   ;;  %s428_s1 = inlined_call_operand.hbm [shape: bf16[32,64], index: 1, kind: input, shape index: {}]   ;;  %s429_s2 = inlined_call_operand.vmem [shape: f32[1,64], index: 2, kind: input, shape index: {}]   ;;  %s430_s3 = inlined_call_operand.hbm [shape: bf16[64,128], index: 3, kind: input, shape index: {}]   ;;  %s431_s4 = inlined_call_operand.vmem [shape: f32[1,128], index: 4, kind: input, shape index: {}]   ;;  %s432_s5 = inlined_call_operand.hbm [shape: f32[8,128], index: 5, kind: output, shape index: {}]  }
   0x1   :  { %11 = vsyncpa [#allocation6], 0 }
   0x2   :  { %12 = vsyncpa [#allocation4], 0  ;;  %s371_s18 = smov [#allocation5]  }
   0x3   :  { %s28_s19 = sshll.u32 %s371_s18, 4  ;;  %s29_s19 = int_to_ptr.vmem [resolvable:$true] %s28_s19 }
   0x4   :  { %s293_s20 = scalar_lea.vmem %s29_s19, 256  ;;  %p298_p1 = scmp.lt.s32.totalorder %s29_s19, %s29_s19 }
   0x5   :  { %p294_p0 = scmp.ne.s32.totalorder %s29_s19, %s293_s20  ;;  %p299_p2 = scmp.lt.s32.totalorder %s293_s20, %s293_s20 }
   0x7   :  { %p300_p3 = por %p299_p2, %p298_p1 }
   0x9   :  { %p301_p4 = pnand %p300_p3, %p294_p0 }
   0xb   :  { %304 = shalt.err (!%p301_p4)
}
   0xc   :  { %s372_s21 = smov 64   ;;  %s373_s22 = smov 4  }
   0xd   :  { %34 = dma.hbm_to_vmem [thread:$0]  %s428_s1, 256, %s29_s19, [#allocation6], %s372_s21, %s372_s21, %s373_s22  }
   0xe   :  { %s374_s25 = smov [#allocation2]   ;;  %s375_s27 = smov [#allocation7]  }
   0xf   :  { %s19_s26 = sshll.u32 %s374_s25, 4  ;;  %s42_s28 = sshll.u32 %s375_s27, 4  ;;  %s20_s26 = int_to_ptr.vmem [resolvable:$true] %s19_s26  ;;  %s43_s28 = int_to_ptr.vmem [resolvable:$true] %s42_s28 }
  0x10   :  { %s313_s29 = scalar_lea.vmem %s20_s26, 64  ;;  %p318_p6 = scmp.lt.s32.totalorder %s20_s26, %s20_s26 }
  0x11   :  { %p314_p5 = scmp.ne.s32.totalorder %s20_s26, %s313_s29  ;;  %p319_p7 = scmp.lt.s32.totalorder %s313_s29, %s313_s29 }
  0x13   :  { %p320_p8 = por %p319_p7, %p318_p6 }
  0x15   :  { %p321_p9 = pnand %p320_p8, %p314_p5 }
  0x17   :  { %324 = shalt.err (!%p321_p9)
}
  0x18   :  { %22 = dma.hbm_to_vmem [thread:$0]  %s427_s0, 64, %s20_s26, [#allocation3]  }
  0x19   :  { %s333_s7 = scalar_lea.vmem %s43_s28, 512  ;;  %p338_p11 = scmp.lt.s32.totalorder %s43_s28, %s43_s28 }
  0x1a   :  { %p334_p10 = scmp.ne.s32.totalorder %s43_s28, %s333_s7  ;;  %p339_p12 = scmp.lt.s32.totalorder %s333_s7, %s333_s7 }
  0x1c   :  { %p340_p13 = por %p339_p12, %p338_p11 }
  0x1e   :  { %p341_p0 = pnand %p340_p13, %p334_p10 }
  0x20   :  { %344 = shalt.err (!%p341_p0)
}
  0x21   :  { %48 = dma.hbm_to_vmem [thread:$0]  %s430_s3, 512, %s43_s28, [#allocation6], %s372_s21, %s372_s21, %s373_s22  }
  0x22   :  { %365 = dma.done.wait [#allocation3], 64  }
  0x23   :  { %366 = vsyncadd [#allocation3], 4294967232 }
  0x24   :  { %367 = dma.done.wait [#allocation6], 768  }
  0x25   :  { %368 = vsyncadd [#allocation6], 4294966528  ;;  %v376_v0 = vmov 0.0   ;;  %vm377_vm0 = vmmov 0   ;;  %v277_v1 = vld [vmem:[#allocation5 + $0x8] sm:$0xff]   ;;  %v278_v2 = vld [vmem:[#allocation5] sm:$0xff]  }
  0x26   :  { %249 = vmatprep.subr.bf16.mxu0 %v376_v0  ;;  %253 = vmatprep.mubr.msk.bf16.mxu0 %vm377_vm0, %v376_v0  ;;  %v61_v3 = vld [vmem:[#allocation2] sm:$0xf]  ;;  %vm85_vm1 = vcmask 261120   ;;  %v279_v4 = vld [vmem:[#allocation7 + $0x18] sm:$0xff]   ;;  %v280_v5 = vld [vmem:[#allocation7 + $0x10] sm:$0xff]   ;;  %vm170_vm2 = vcmask 523264  }
  0x27   :  { %257 = vmatprep.subr.bf16.mxu1 %v376_v0  ;;  %265 = vmatprep.mubr.msk.bf16.mxu1 %vm377_vm0, %v376_v0  ;;  %v281_v6 = vld [vmem:[#allocation7 + $0x8] sm:$0xff]   ;;  %v282_v7 = vld [vmem:[#allocation7] sm:$0xff]   ;;  %s378_s11 = smov [#allocation8]  }
  0x28   :  { %250 = vmatpush3.bf16.msra.mxu0 %v277_v1  ;;  %258 = vmatpush3.bf16.msra.mxu1 %v279_v4  ;;  %v231_v8 = vld [vmem:[%s429_s2] ss:$0 sm:$0xff]  ;;  %s221_s12 = sshll.u32 %s378_s11, 4  ;;  %s222_s12 = int_to_ptr.vmem [resolvable:$true] %s221_s12 }
  0x29   :  { %251 = vmatprep.subr.bf16.mxu0 %v376_v0  ;;  %259 = vmatprep.subr.bf16.mxu1 %v376_v0  ;;  %v235_v16 = vld [vmem:[%s431_s4] ss:$0 sm:$0xff]  ;;  %s345_s2 = scalar_lea.vmem %s222_s12, 128  ;;  %p350_p2 = scmp.lt.s32.totalorder %s222_s12, %s222_s12 }
  0x2a   :  { %p346_p1 = scmp.ne.s32.totalorder %s222_s12, %s345_s2  ;;  %p351_p3 = scmp.lt.s32.totalorder %s345_s2, %s345_s2 }
  0x2c   :  { %252 = vmatpush3.bf16.msra.mxu0 %v278_v2  ;;  %260 = vmatpush3.bf16.msra.mxu1 %v280_v5  ;;  %p352_p4 = por %p351_p3, %p350_p2 }
  0x2d   :  { %261 = vmatprep.subr.bf16.mxu1 %v376_v0 }
  0x2e   :  { %p353_p5 = pnand %p352_p4, %p346_p1 }
  0x2f   :  { %254 = vmatmul.mubr.msk.bf16.vlgmr.msra.gmra.mxu0 %vm85_vm1, %v61_v3 }
  0x30   :  { %262 = vmatpush3.bf16.msra.mxu1 %v281_v6 }
  0x31   :  { %263 = vmatprep.subr.bf16.mxu1 %v376_v0 }
  0x34   :  { %264 = vmatpush3.bf16.msra.mxu1 %v282_v7 }
  0xef   :  { %v123_v9 = vpop.f32.mrf.mxu0 }
  0xf0   :  { %v124_v10 = vadd.f32 %v231_v8, %v123_v9 }
  0xf1   :  { %v255_v11 = vpop.f32.mrf.mxu0 }
  0xf2   :  { %283 = vtanh.f32 %v124_v10 }
  0xf3   :  { %v126_v12 = vpop.f32.mrf.mxu0 }
  0xf5   :  { %v256_v13 = vpop.f32.mrf.mxu0 }
  0xff   :  { %v284_v14 = vpop.eup %283 }
 0x100   :  { %v130_v15 = vpack.c.bf16 %v284_v14, %v284_v14 }
 0x102   :  { %266 = vmatmul.mubr.msk.bf16.vlgmr.msra.gmra.mxu1 %vm170_vm2, %v130_v15 }
 0x1c2   :  { %v208_v17 = vpop.f32.mrf.mxu1 }
 0x1c3   :  { %v209_v18 = vadd.f32 %v235_v16, %v208_v17 }
 0x1c4   :  { %v267_v19 = vpop.f32.mrf.mxu1 }
 0x1c5   :  { %214 = vst [vmem:[#allocation8] sm:$0xff] %v209_v18 }
 0x1c6   :  { %v211_v20 = vpop.f32.mrf.mxu1 }
 0x1c7   :  { %356 = shalt.err (!%p353_p5)
}
 0x1c8   :  { %224 = dma.vmem_to_hbm [thread:$0]  %s222_s12, 128, %s432_s5, [#allocation4]   ;;  %v268_v21 = vpop.f32.mrf.mxu1 }
 0x1c9   :  { %369 = dma.done.wait [#allocation4], 128  }
 0x1ca   :  { %370 = vsyncadd [#allocation4], 4294967168 }
 0x1cb   :  { %228 = vsyncpa [#allocation3], 1 }
 0x1cc   :  { %229 = vsyncpa [#allocation6], 1 }
 0x1cd   :  { %230 = vsyncpa [#allocation4], 1 }

</bundles_post_ra>
